<compile_context>
chip_gen: v5e
topology: v5e:2x2
jax: 0.10.0
libtpu: 0.0.40
codegen_flags: <defaults>
</compile_context>

<pallas_src>
import jax
import jax.numpy as jnp
from jax.experimental import pallas as pl
from jax.experimental.pallas import tpu as pltpu


def _round_up(x, m):
    return (x + m - 1) // m * m


def dqn_kernel(x_ref, w1_ref, b1_ref, w2_ref, b2_ref, w3_ref, b3_ref, o_ref):
    # Cast activations to bf16 in-kernel (VPU, free under MXU/DMA slack).
    x = x_ref[...].astype(w1_ref.dtype)
    # fc1 + relu  (bf16 x bf16 -> f32 accumulate on the MXU)
    h1 = jnp.dot(x, w1_ref[...], preferred_element_type=jnp.float32)
    h1 = jnp.maximum(h1 + b1_ref[...], 0.0).astype(w2_ref.dtype)
    # fc2 + relu
    h2 = jnp.dot(h1, w2_ref[...], preferred_element_type=jnp.float32)
    h2 = jnp.maximum(h2 + b2_ref[...], 0.0).astype(w3_ref.dtype)
    # fc3: 128-wide matmul, then narrow to the true output width before storing
    out = jnp.dot(h2, w3_ref[...], preferred_element_type=jnp.float32)
    out_dim = o_ref.shape[-1]                      # static (true output width)
    o_ref[...] = (out[:, :out_dim] + b3_ref[...]).astype(o_ref.dtype)


def prepare_params(params, *, compute_dtype=jnp.bfloat16):
    """One-time (outside the hot path) pad + cast of weights/biases.

    Zero padding is exact: padded hidden units get zero weight + zero bias, so
    they stay at 0 through ReLU and contribute nothing downstream; padded fc3
    output columns are sliced off inside the kernel. b3 is kept at its true
    width so the kernel/wrapper recover out_dim statically from its shape.
    """
    in_dim, hidden = params["w1"].shape
    out_dim = params["w3"].shape[1]
    HID = _round_up(hidden, 128)     # 64 -> 128: full-lane intermediates
    OUTP = _round_up(out_dim, 128)   # fc3 matmul runs at 128 lanes, store is narrow

    def pad_to(a, shape):
        return jnp.pad(a, [(0, s - d) for d, s in zip(a.shape, shape)])

    return {
        "w1": pad_to(params["w1"], (in_dim, HID)).astype(compute_dtype),
        "b1": pad_to(params["b1"], (1, HID)).astype(jnp.float32),
        "w2": pad_to(params["w2"], (HID, HID)).astype(compute_dtype),
        "b2": pad_to(params["b2"], (1, HID)).astype(jnp.float32),
        "w3": pad_to(params["w3"], (HID, OUTP)).astype(compute_dtype),
        "b3": params["b3"].astype(jnp.float32),   # true width -> static out_dim
    }


def dqn_forward(x, prep):
    """x: (B, input_dim) float32. prep: output of prepare_params()."""
    B, in_dim = x.shape
    assert prep["w1"].shape[0] == in_dim
    HID = prep["w1"].shape[1]
    OUTP = prep["w3"].shape[1]
    out_dim = prep["b3"].shape[1]

    # Batch tile: large to amortize the ~0.35us/step pipeline overhead, but
    # ~ceil(B/2) so the parallel batch axis has >= 2 steps (v7x megacore) once
    # B is big enough. Multiple of 16 for bf16 sublane packing.
    TB_MAX = 4096
    TB = max(16, min(TB_MAX, _round_up(pl.cdiv(max(B, 1), 2), 16)))
    grid_b = pl.cdiv(B, TB)

    flops = 2 * grid_b * TB * (in_dim * HID + HID * HID + HID * OUTP)
    bytes_accessed = (
        B * in_dim * 4
        + sum(a.size * a.dtype.itemsize for a in prep.values())
        + B * out_dim * 4
    )

    return pl.pallas_call(
        dqn_kernel,
        out_shape=jax.ShapeDtypeStruct((B, out_dim), jnp.float32),
        grid=(grid_b,),
        in_specs=[
            # activations: tiled over batch, pipelined against HBM
            pl.BlockSpec((TB, in_dim), lambda i: (i, 0)),
            # weights / biases: same block every step -> stay VMEM-resident
            pl.BlockSpec((in_dim, HID), lambda i: (0, 0)),
            pl.BlockSpec((1, HID), lambda i: (0, 0)),
            pl.BlockSpec((HID, HID), lambda i: (0, 0)),
            pl.BlockSpec((1, HID), lambda i: (0, 0)),
            pl.BlockSpec((HID, OUTP), lambda i: (0, 0)),
            pl.BlockSpec((1, out_dim), lambda i: (0, 0)),
        ],
        # Narrow, true-width output store: block last dim == full array dim.
        out_specs=pl.BlockSpec((TB, out_dim), lambda i: (i, 0)),
        compiler_params=pltpu.CompilerParams(
            dimension_semantics=("parallel",),      # megacore on v7x; no-op elsewhere
            vmem_limit_bytes=48 * 1024 * 1024,      # explicit budget, safe on v7x 64 MiB
        ),
        cost_estimate=pl.CostEstimate(
            flops=flops, transcendentals=0, bytes_accessed=bytes_accessed
        ),
    )(x, prep["w1"], prep["b1"], prep["w2"], prep["b2"], prep["w3"], prep["b3"])


def init_params(key, input_dim, output_dim, hidden=64):
    """Deterministic init mimicking PyTorch Linear (uniform +-1/sqrt(fan_in))."""
    def linear(k, fan_in, fan_out):
        kw, kb = jax.random.split(k)
        bound = 1.0 / jnp.sqrt(jnp.float32(fan_in))
        w = jax.random.uniform(kw, (fan_in, fan_out), jnp.float32, -bound, bound)
        b = jax.random.uniform(kb, (1, fan_out), jnp.float32, -bound, bound)
        return w, b

    k1, k2, k3 = jax.random.split(key, 3)
    w1, b1 = linear(k1, input_dim, hidden)
    w2, b2 = linear(k2, hidden, hidden)
    w3, b3 = linear(k3, hidden, output_dim)
    return {"w1": w1, "b1": b1, "w2": w2, "b2": b2, "w3": w3, "b3": b3}


def dqn_reference(x, p):
    h1 = jnp.maximum(x @ p["w1"] + p["b1"], 0.0)
    h2 = jnp.maximum(h1 @ p["w2"] + p["b2"], 0.0)
    return h2 @ p["w3"] + p["b3"]


if __name__ == "__main__":
    key = jax.random.PRNGKey(0)
    k_params, k_x = jax.random.split(key)

    batch, input_dim, output_dim = 4, 32, 8
    params = init_params(k_params, input_dim, output_dim)
    prep = prepare_params(params)          # one-time pad/cast, outside hot path
    x = jax.random.normal(k_x, (batch, input_dim), jnp.float32)

    fwd = jax.jit(dqn_forward)
    out = jax.block_until_ready(fwd(x, prep))

    ref = dqn_reference(x, params)
    assert out.shape == (batch, output_dim)
    # bf16 matmul operands (f32 accumulation) -> loosened tolerance vs f32 reference.
    assert jnp.allclose(out, ref, atol=5e-2, rtol=5e-2), "mismatch vs JAX reference"

    print("KERNEL_OK")
</pallas_src>

<mosaic_0001>
module attributes {stable_mosaic.version = 11 : i64} {
  func.func @dqn_kernel(%arg0: i32, %arg1: memref<16x32xf32, #tpu.memory_space<vmem>>, %arg2: memref<32x128xbf16, #tpu.memory_space<vmem>>, %arg3: memref<1x128xf32, #tpu.memory_space<vmem>>, %arg4: memref<128x128xbf16, #tpu.memory_space<vmem>>, %arg5: memref<1x128xf32, #tpu.memory_space<vmem>>, %arg6: memref<128x128xbf16, #tpu.memory_space<vmem>>, %arg7: memref<1x8xf32, #tpu.memory_space<vmem>>, %arg8: memref<16x8xf32, #tpu.memory_space<vmem>>) attributes {dimension_semantics = [#tpu.dimension_semantics<parallel>], iteration_bounds = array<i64: 1>, scalar_prefetch = 0 : i64, scratch_operands = 0 : i64, tpu.core_type = #tpu.core_type<tc>, window_params = [{transform_indices = @transform_0, window_bounds = array<i64: 16, 32>}, {pipeline_mode = #tpu.pipeline_mode<synchronous>, transform_indices = @transform_1, window_bounds = array<i64: 32, 128>}, {pipeline_mode = #tpu.pipeline_mode<synchronous>, transform_indices = @transform_2, window_bounds = array<i64: 1, 128>}, {pipeline_mode = #tpu.pipeline_mode<synchronous>, transform_indices = @transform_3, window_bounds = array<i64: 128, 128>}, {pipeline_mode = #tpu.pipeline_mode<synchronous>, transform_indices = @transform_4, window_bounds = array<i64: 1, 128>}, {pipeline_mode = #tpu.pipeline_mode<synchronous>, transform_indices = @transform_5, window_bounds = array<i64: 128, 128>}, {pipeline_mode = #tpu.pipeline_mode<synchronous>, transform_indices = @transform_6, window_bounds = array<i64: 1, 8>}, {transform_indices = @transform_7, window_bounds = array<i64: 16, 8>}]} {
    %c0 = arith.constant 0 : index
    %c0_0 = arith.constant 0 : index
    %0 = vector.load %arg1[%c0, %c0_0] : memref<16x32xf32, #tpu.memory_space<vmem>>, vector<16x32xf32>
    %1 = arith.truncf %0 : vector<16x32xf32> to vector<16x32xbf16>
    %c0_1 = arith.constant 0 : index
    %c0_2 = arith.constant 0 : index
    %2 = vector.load %arg2[%c0_1, %c0_2] : memref<32x128xbf16, #tpu.memory_space<vmem>>, vector<32x128xbf16>
    %cst = arith.constant dense<0.000000e+00> : vector<16x128xf32>
    %3 = tpu.matmul %1, %2, %cst {dimension_numbers = #tpu.dot_dimension_numbers<[1], [0], [0], [1], [0, 0, 1, 1], [], []>} : vector<16x32xbf16>, vector<32x128xbf16>, vector<16x128xf32> -> vector<16x128xf32>
    %c0_3 = arith.constant 0 : index
    %c0_4 = arith.constant 0 : index
    %4 = vector.load %arg3[%c0_3, %c0_4] : memref<1x128xf32, #tpu.memory_space<vmem>>, vector<1x128xf32>
    %5 = vector.broadcast %4 : vector<1x128xf32> to vector<16x128xf32>
    %6 = arith.addf %3, %5 : vector<16x128xf32>
    %cst_5 = arith.constant 0.000000e+00 : f32
    %7 = vector.broadcast %cst_5 : f32 to vector<16x128xf32>
    %8 = arith.maximumf %6, %7 : vector<16x128xf32>
    %9 = arith.truncf %8 : vector<16x128xf32> to vector<16x128xbf16>
    %c0_6 = arith.constant 0 : index
    %c0_7 = arith.constant 0 : index
    %10 = vector.load %arg4[%c0_6, %c0_7] : memref<128x128xbf16, #tpu.memory_space<vmem>>, vector<128x128xbf16>
    %cst_8 = arith.constant dense<0.000000e+00> : vector<16x128xf32>
    %11 = tpu.matmul %9, %10, %cst_8 {dimension_numbers = #tpu.dot_dimension_numbers<[1], [0], [0], [1], [0, 0, 1, 1], [], []>} : vector<16x128xbf16>, vector<128x128xbf16>, vector<16x128xf32> -> vector<16x128xf32>
    %c0_9 = arith.constant 0 : index
    %c0_10 = arith.constant 0 : index
    %12 = vector.load %arg5[%c0_9, %c0_10] : memref<1x128xf32, #tpu.memory_space<vmem>>, vector<1x128xf32>
    %13 = vector.broadcast %12 : vector<1x128xf32> to vector<16x128xf32>
    %14 = arith.addf %11, %13 : vector<16x128xf32>
    %cst_11 = arith.constant 0.000000e+00 : f32
    %15 = vector.broadcast %cst_11 : f32 to vector<16x128xf32>
    %16 = arith.maximumf %14, %15 : vector<16x128xf32>
    %17 = arith.truncf %16 : vector<16x128xf32> to vector<16x128xbf16>
    %c0_12 = arith.constant 0 : index
    %c0_13 = arith.constant 0 : index
    %18 = vector.load %arg6[%c0_12, %c0_13] : memref<128x128xbf16, #tpu.memory_space<vmem>>, vector<128x128xbf16>
    %cst_14 = arith.constant dense<0.000000e+00> : vector<16x128xf32>
    %19 = tpu.matmul %17, %18, %cst_14 {dimension_numbers = #tpu.dot_dimension_numbers<[1], [0], [0], [1], [0, 0, 1, 1], [], []>} : vector<16x128xbf16>, vector<128x128xbf16>, vector<16x128xf32> -> vector<16x128xf32>
    %20 = vector.extract_strided_slice %19 {offsets = [0, 0], sizes = [16, 8], strides = [1, 1]} : vector<16x128xf32> to vector<16x8xf32>
    %c0_15 = arith.constant 0 : index
    %c0_16 = arith.constant 0 : index
    %21 = vector.load %arg7[%c0_15, %c0_16] : memref<1x8xf32, #tpu.memory_space<vmem>>, vector<1x8xf32>
    %22 = vector.broadcast %21 : vector<1x8xf32> to vector<16x8xf32>
    %23 = arith.addf %20, %22 : vector<16x8xf32>
    %c0_17 = arith.constant 0 : index
    %c0_18 = arith.constant 0 : index
    %24 = vector.load %arg8[%c0_17, %c0_18] : memref<16x8xf32, #tpu.memory_space<vmem>>, vector<16x8xf32>
    tpu.vector_store %arg8[%c0_17, %c0_18], %23 {strides = array<i32>} : memref<16x8xf32, #tpu.memory_space<vmem>>, vector<16x8xf32>,
    return
  }
  func.func @transform_0(%arg0: i32) -> (i32, i32) {
    %c0_i32 = arith.constant 0 : i32
    %c0_i32_0 = arith.constant 0 : i32
    return %arg0, %c0_i32 : i32, i32
  }
  func.func @transform_1(%arg0: i32) -> (i32, i32) {
    %c0_i32 = arith.constant 0 : i32
    %c0_i32_0 = arith.constant 0 : i32
    %c0_i32_1 = arith.constant 0 : i32
    return %c0_i32, %c0_i32_0 : i32, i32
  }
  func.func @transform_2(%arg0: i32) -> (i32, i32) {
    %c0_i32 = arith.constant 0 : i32
    %c0_i32_0 = arith.constant 0 : i32
    %c0_i32_1 = arith.constant 0 : i32
    return %c0_i32, %c0_i32_0 : i32, i32
  }
  func.func @transform_3(%arg0: i32) -> (i32, i32) {
    %c0_i32 = arith.constant 0 : i32
    %c0_i32_0 = arith.constant 0 : i32
    %c0_i32_1 = arith.constant 0 : i32
    return %c0_i32, %c0_i32_0 : i32, i32
  }
  func.func @transform_4(%arg0: i32) -> (i32, i32) {
    %c0_i32 = arith.constant 0 : i32
    %c0_i32_0 = arith.constant 0 : i32
    %c0_i32_1 = arith.constant 0 : i32
    return %c0_i32, %c0_i32_0 : i32, i32
  }
  func.func @transform_5(%arg0: i32) -> (i32, i32) {
    %c0_i32 = arith.constant 0 : i32
    %c0_i32_0 = arith.constant 0 : i32
    %c0_i32_1 = arith.constant 0 : i32
    return %c0_i32, %c0_i32_0 : i32, i32
  }
  func.func @transform_6(%arg0: i32) -> (i32, i32) {
    %c0_i32 = arith.constant 0 : i32
    %c0_i32_0 = arith.constant 0 : i32
    %c0_i32_1 = arith.constant 0 : i32
    return %c0_i32, %c0_i32_0 : i32, i32
  }
  func.func @transform_7(%arg0: i32) -> (i32, i32) {
    %c0_i32 = arith.constant 0 : i32
    %c0_i32_0 = arith.constant 0 : i32
    return %arg0, %c0_i32 : i32, i32
  }
}

</mosaic_0001>

<bundles_post_ra>
// kernel: dqn_forward.1
= control target key start
LH: loop header
LB: loop body
LE: loop exit
PB: predicated region body
PF: predicated region fallthrough
CT: control target
= control target key end

     0   :  { %12 = vsyncpa [#allocation3], 0  ;;  %s682_s0 = inlined_call_operand.hbm [shape: f32[4,32], index: 0, kind: input, shape index: {}]   ;;  %s683_s1 = inlined_call_operand.hbm [shape: bf16[32,128], index: 1, kind: input, shape index: {}]   ;;  %s684_s2 = inlined_call_operand.hbm [shape: f32[1,128], index: 2, kind: input, shape index: {}]   ;;  %s685_s3 = inlined_call_operand.hbm [shape: bf16[128,128], index: 3, kind: input, shape index: {}]   ;;  %s686_s4 = inlined_call_operand.vmem [shape: f32[1,128], index: 4, kind: input, shape index: {}]   ;;  %s687_s5 = inlined_call_operand.hbm [shape: bf16[128,128], index: 5, kind: input, shape index: {}]   ;;  %s688_s6 = inlined_call_operand.vmem [shape: f32[1,8], index: 6, kind: input, shape index: {}]   ;;  %s689_s7 = inlined_call_operand.hbm [shape: f32[4,8], index: 7, kind: output, shape index: {}]  }
   0x1   :  { %13 = vsyncpa [#allocation6], 0 }
   0x2   :  { %14 = vsyncpa [#allocation9], 0 }
   0x3   :  { %15 = vsyncpa [#allocation4], 0 }
   0x4   :  { %19 = vsyncadd [#allocation3], 192  ;;  %s33_s26 = sshll.u32 %s683_s1, 4  ;;  %s595_s27 = smov [#allocation5]   ;;  %s34_s26 = int_to_ptr.hbm [resolvable:$true] %s33_s26 }
   0x5   :  { %s35_s28 = sshll.u32 %s595_s27, 4  ;;  %s57_s8 = sshll.u32 %s685_s3, 4  ;;  %s36_s28 = int_to_ptr.vmem [resolvable:$true] %s35_s28  ;;  %s58_s8 = int_to_ptr.hbm [resolvable:$true] %s57_s8 }
   0x6   :  { %s596_s9 = smov 64   ;;  %s597_s10 = smov 4  }
   0x7   :  { %41 = dma.hbm_to_vmem [thread:$0]  %s34_s26, 256, %s36_s28, [#allocation6], %s596_s9, %s596_s9, %s597_s10  }
   0x8   :  { %s598_s11 = smov [#allocation8]   ;;  %s20_s1 = sshll.u32 %s682_s0, 4  ;;  %s21_s1 = int_to_ptr.hbm [resolvable:$true] %s20_s1 }
   0x9   :  { %s59_s12 = sshll.u32 %s598_s11, 4  ;;  %s47_s16 = sshll.u32 %s684_s2, 4  ;;  %s60_s12 = int_to_ptr.vmem [resolvable:$true] %s59_s12  ;;  %s48_s16 = int_to_ptr.hbm [resolvable:$true] %s47_s16 }
   0xa   :  { %65 = dma.hbm_to_vmem [thread:$0]  %s58_s8, 1024, %s60_s12, [#allocation9], %s596_s9, %s596_s9, %s597_s10  }
   0xb   :  { %s599_s17 = smov [#allocation2]   ;;  %s600_s19 = smov [#allocation7]  }
   0xc   :  { %s22_s18 = sshll.u32 %s599_s17, 4  ;;  %s49_s0 = sshll.u32 %s600_s19, 4  ;;  %s23_s18 = int_to_ptr.vmem [resolvable:$true] %s22_s18  ;;  %s50_s0 = int_to_ptr.vmem [resolvable:$true] %s49_s0 }
   0xd   :  { %28 = dma.hbm_to_vmem [thread:$0]  %s21_s1, 64, %s23_s18, [#allocation3], %s596_s9, %s596_s9, %s597_s10  }
   0xe   :  { %s72_s22 = sshll.u32 %s687_s5, 4  ;;  %s601_s23 = smov [#allocation10]   ;;  %s73_s22 = int_to_ptr.hbm [resolvable:$true] %s72_s22 }
   0xf   :  { %52 = dma.hbm_to_vmem [thread:$0]  %s48_s16, 16, %s50_s0, [#allocation6]  }
  0x10   :  { %s74_s24 = sshll.u32 %s601_s23, 4  ;;  %s75_s24 = int_to_ptr.vmem [resolvable:$true] %s74_s24 }
  0x11   :  { %80 = dma.hbm_to_vmem [thread:$0]  %s73_s22, 1024, %s75_s24, [#allocation9], %s596_s9, %s596_s9, %s597_s10  }
  0x12   :  { %587 = dma.done.wait [#allocation3], 256  }
  0x13   :  { %588 = vsyncadd [#allocation3], 4294967040 }
  0x14   :  { %589 = dma.done.wait [#allocation6], 272  }
  0x15   :  { %590 = vsyncadd [#allocation6], 4294967024 }
  0x16   :  { %591 = dma.done.wait [#allocation9], 2048  }
  0x17   :  { %592 = vsyncadd [#allocation9], 4294965248  ;;  %v415_v0 = vld [vmem:[#allocation5 + $0x8] sm:$0xff]  ;;  %v414_v1 = vld [vmem:[#allocation5] sm:$0xff]  ;;  %vm127_vm0 = vcmask 261120   ;;  %vm317_vm1 = vcmask 64512  }
  0x18   :  { %v423_v2 = vld [vmem:[#allocation8 + $0x38] sm:$0xff]  ;;  %137 = vmatpush.bf16.msra.mxu0 %v415_v0  ;;  %v105_v4 = vld [vmem:[#allocation2 + $0x8] sm:$0xff]  ;;  %v422_v5 = vld [vmem:[#allocation8 + $0x30] sm:$0xff] }
  0x19   :  { %v104_v3 = vld [vmem:[#allocation2] sm:$0xff]  ;;  %216 = vmatpush.bf16.msra.mxu1 %v423_v2  ;;  %v421_v7 = vld [vmem:[#allocation8 + $0x28] sm:$0xff]  ;;  %v418_v10 = vld [vmem:[#allocation8 + $0x10] sm:$0xff] }
  0x1a   :  { %v106_v6 = vpack.c.bf16 %v105_v4, %v104_v3  ;;  %v420_v8 = vld [vmem:[#allocation8 + $0x20] sm:$0xff]  ;;  %v419_v9 = vld [vmem:[#allocation8 + $0x18] sm:$0xff]  ;;  %v417_v11 = vld [vmem:[#allocation8 + $0x8] sm:$0xff] }
  0x1b   :  { %v416_v12 = vld [vmem:[#allocation8] sm:$0xff]  ;;  %v431_v13 = vld [vmem:[#allocation10 + $0x38] sm:$0xff]  ;;  %v430_v14 = vld [vmem:[#allocation10 + $0x30] sm:$0xff] }
  0x1c   :  { %138 = vmatpush.bf16.msra.mxu0 %v414_v1  ;;  %297 = vmatpush.bf16.msra.mxu2 %v431_v13  ;;  %v429_v15 = vld [vmem:[#allocation10 + $0x28] sm:$0xff]  ;;  %v428_v16 = vld [vmem:[#allocation10 + $0x20] sm:$0xff]  ;;  %v440_v18 = vld [vmem:[#allocation7] ss:$0 sm:$0xff] }
  0x1d   :  { %217 = vmatpush.bf16.msra.mxu1 %v422_v5  ;;  %v427_v25 = vld [vmem:[#allocation10 + $0x18] sm:$0xff]  ;;  %v426_v26 = vld [vmem:[#allocation10 + $0x10] sm:$0xff]  ;;  %v425_v27 = vld [vmem:[#allocation10 + $0x8] sm:$0xff] }
  0x1e   :  { %v424_v28 = vld [vmem:[#allocation10] sm:$0xff]  ;;  %v441_v30 = vld [vmem:[%s686_s4] ss:$0 sm:$0xff] }
  0x1f   :  { %349 = vmatmul.msk.bf16.vlgmr.msra.gmra.mxu0 %vm127_vm0, %v106_v6  ;;  %v442_v37 = vld [vmem:[%s688_s6] ss:$0 sm:$0xff] }
  0x20   :  { %298 = vmatpush.bf16.msra.mxu2 %v430_v14 }
  0x21   :  { %218 = vmatpush.bf16.msra.mxu1 %v421_v7 }
  0x24   :  { %299 = vmatpush.bf16.msra.mxu2 %v429_v15 }
  0x25   :  { %219 = vmatpush.bf16.msra.mxu1 %v420_v8 }
  0x28   :  { %300 = vmatpush.bf16.msra.mxu2 %v428_v16 }
  0x29   :  { %220 = vmatpush.bf16.msra.mxu1 %v419_v9 }
  0x2c   :  { %301 = vmatpush.bf16.msra.mxu2 %v427_v25 }
  0x2d   :  { %221 = vmatpush.bf16.msra.mxu1 %v418_v10 }
  0x30   :  { %302 = vmatpush.bf16.msra.mxu2 %v426_v26 }
  0x31   :  { %222 = vmatpush.bf16.msra.mxu1 %v417_v11 }
  0x34   :  { %303 = vmatpush.bf16.msra.mxu2 %v425_v27 }
  0x35   :  { %223 = vmatpush.bf16.msra.mxu1 %v416_v12 }
  0x38   :  { %304 = vmatpush.bf16.msra.mxu2 %v424_v28 }
  0x9c   :  { %v140_v17 = vpop.f32.mrf.mxu0 }
  0x9d   :  { %v141_v19 = vadd.f32 %v440_v18, %v140_v17 }
  0x9f   :  { %v145_v22 = vmax.f32 %v141_v19, 0.0 }
  0xa4   :  { %v142_v20 = vpop.f32.mrf.mxu0 }
  0xa5   :  { %v143_v21 = vadd.f32 %v440_v18, %v142_v20 }
  0xa7   :  { %v146_v23 = vmax.f32 %v143_v21, 0.0 }
  0xa9   :  { %v147_v24 = vpack.c.bf16 %v146_v23, %v145_v22 }
  0xab   :  { %224 = vmatmul.bf16.vlgmr.msra.gmra.mxu1 %v147_v24 }
 0x128   :  { %v225_v29 = vpop.f32.mrf.mxu1 }
 0x129   :  { %v226_v31 = vadd.f32 %v441_v30, %v225_v29 }
 0x12b   :  { %v230_v34 = vmax.f32 %v226_v31, 0.0 }
 0x130   :  { %v227_v32 = vpop.f32.mrf.mxu1 }
 0x131   :  { %v228_v33 = vadd.f32 %v441_v30, %v227_v32 }
 0x133   :  { %v231_v35 = vmax.f32 %v228_v33, 0.0 }
 0x135   :  { %v232_v36 = vpack.c.bf16 %v231_v35, %v230_v34 }
 0x137   :  { %305 = vmatmul.bf16.vlgmr.msra.gmra.mxu2 %v232_v36 }
 0x1ba   :  { %v306_v38 = vpop.f32.mrf.mxu2 }
 0x1bb   :  { %v315_v39 = vadd.f32 %v442_v37, %v306_v38 }
 0x1bd   :  { %318 = vst.msk [vmem:[#allocation11] sm:$0xff] %vm317_vm1, %v315_v39 }
 0x1c2   :  { %v308_v40 = vpop.f32.mrf.mxu2 }
 0x1c3   :  { %v316_v41 = vadd.f32 %v442_v37, %v308_v40 }
 0x1c5   :  { %319 = vst.msk [vmem:[#allocation11 + $0x8] sm:$0xff] %vm317_vm1, %v316_v41 }
 0x1c6   :  { %323 = vsyncadd [#allocation4], 192  ;;  %s326_s28 = sshll.u32 %s689_s7, 4  ;;  %s602_s29 = smov [#allocation11]   ;;  %s327_s28 = int_to_ptr.hbm [resolvable:$true] %s326_s28 }
 0x1c7   :  { %s324_s30 = sshll.u32 %s602_s29, 4  ;;  %s325_s30 = int_to_ptr.vmem [resolvable:$true] %s324_s30 }
 0x1c8   :  { %332 = dma.vmem_to_hbm [thread:$0]  %s325_s30, 64, %s327_s28, [#allocation4], %s596_s9, %s596_s9, %s597_s10  }
 0x1c9   :  { %593 = dma.done.wait [#allocation4], 256  }
 0x1ca   :  { %594 = vsyncadd [#allocation4], 4294967040 }
 0x1cb   :  { %337 = vsyncpa [#allocation3], 1 }
 0x1cc   :  { %338 = vsyncpa [#allocation6], 1 }
 0x1cd   :  { %339 = vsyncpa [#allocation9], 1 }
 0x1ce   :  { %340 = vsyncpa [#allocation4], 1 }

</bundles_post_ra>
